<compile_context>
chip_gen: v7x
topology: tpu7x:2x2x1
jax: 0.10.0
libtpu: 0.0.40
codegen_flags: <defaults>
</compile_context>

<pallas_src>
import functools

import jax
import jax.numpy as jnp
import numpy as np
from jax import lax
from jax.experimental import pallas as pl
from jax.experimental.pallas import tpu as pltpu


_PALLAS_MIN_BYTES = 1 << 20  # below this, plain XLA slices beat a pallas_call


def _sublane_min(itemsize):
    # minimum second-to-last tile dim per dtype width
    return {4: 8, 2: 16, 1: 32}.get(int(itemsize), 8)


def _pick_row_tile(R, C, itemsize, sub_min):
    # Keep (input tile + all output tiles) <= ~6 MiB per grid step, so the
    # double-buffered footprint (~12 MiB) fits every generation's scoped
    # VMEM default, while keeping tiles large enough to sit near the HBM
    # copy roofline.
    budget_bytes_per_step = 6 << 20
    rows = budget_bytes_per_step // max(1, 2 * C * itemsize)
    rows = max(sub_min, (rows // sub_min) * sub_min)  # multiple of sublane min
    rows = min(rows, 1024)                            # keep the pipeline granular
    if rows >= R:
        return R                                      # full-extent block: always legal
    return int(rows)


def _split_kernel(x_ref, *out_refs, col_slabs):
    # Pure data movement: each output block receives its static, contiguous
    # column slab of the current row tile.
    for out_ref, (c0, w) in zip(out_refs, col_slabs):
        out_ref[...] = x_ref[:, c0:c0 + w]


def split_pallas(x, split_sizes, dim=-1, *, force_pallas=False):
    """Pallas equivalent of torch.split_with_sizes(x, split_sizes, dim)."""
    ndim = x.ndim
    d = dim % ndim
    split_sizes = tuple(int(s) for s in split_sizes)
    if sum(split_sizes) != x.shape[d]:
        raise ValueError(
            f"split sizes {split_sizes} must sum to dim size {x.shape[d]}")

    # Static element offsets along the split axis.
    offsets, acc = [], 0
    for s in split_sizes:
        offsets.append(acc)
        acc += s

    out_nd_shapes = []
    for s in split_sizes:
        shp = list(x.shape)
        shp[d] = s
        out_nd_shapes.append(tuple(shp))

    itemsize = jnp.dtype(x.dtype).itemsize
    total_bytes = int(x.size) * itemsize

    if not force_pallas and total_bytes < _PALLAS_MIN_BYTES:
        # Tiny tensors: pallas launch + per-step overhead dominates and XLA
        # slices fuse into consumers — skip the kernel entirely.
        return tuple(
            lax.slice_in_dim(x, off, off + sz, axis=d)
            for off, sz in zip(offsets, split_sizes)
        )

    # ---- canonical 2-D view (all reshapes are free: row-major contiguous) ----
    outer = int(np.prod(x.shape[:d], dtype=np.int64)) if d > 0 else 1
    inner = int(np.prod(x.shape[d + 1:], dtype=np.int64)) if d + 1 < ndim else 1
    R = outer
    C = int(x.shape[d]) * inner
    x2 = x.reshape(R, C)

    # Each split is a contiguous column slab [off*inner, (off+sz)*inner).
    col_slabs = tuple((off * inner, sz * inner)
                      for off, sz in zip(offsets, split_sizes))

    sub_min = _sublane_min(itemsize)
    tr = _pick_row_tile(R, C, itemsize, sub_min)
    grid = (pl.cdiv(R, tr),)

    in_spec = pl.BlockSpec((tr, C), lambda i: (i, 0))
    out_specs = tuple(pl.BlockSpec((tr, w), lambda i: (i, 0))
                      for _, w in col_slabs)
    out_shapes = tuple(jax.ShapeDtypeStruct((R, w), x.dtype)
                       for _, w in col_slabs)

    # input tile + all output tiles, once (pipeline double-buffers this).
    per_step_bytes = 2 * tr * C * itemsize
    vmem_limit = int(min(max(4 * per_step_bytes + (4 << 20), 16 << 20), 48 << 20))

    kernel = functools.partial(_split_kernel, col_slabs=col_slabs)

    outs2d = pl.pallas_call(
        kernel,
        out_shape=out_shapes,
        grid=grid,
        in_specs=[in_spec],
        out_specs=out_specs,
        compiler_params=pltpu.CompilerParams(
            dimension_semantics=("parallel",),
            vmem_limit_bytes=vmem_limit,
        ),
        cost_estimate=pl.CostEstimate(
            flops=0,
            transcendentals=0,
            bytes_accessed=2 * total_bytes,   # bandwidth-only op
        ),
    )(x2)

    return tuple(o.reshape(shp) for o, shp in zip(outs2d, out_nd_shapes))


if __name__ == "__main__":
    key = jax.random.PRNGKey(0)
    k1, k2, k3, k4 = jax.random.split(key, 4)

    # 1) 4-D tensor, split on the last axis (the module's default dim=-1).
    x = jax.random.normal(k1, (2, 4, 16, 16), dtype=jnp.float32)
    o0, o1 = jax.block_until_ready(
        split_pallas(x, (6, 10), dim=-1, force_pallas=True))
    assert o0.shape == (2, 4, 16, 6) and o1.shape == (2, 4, 16, 10)
    np.testing.assert_allclose(np.asarray(o0), np.asarray(x[..., :6]))
    np.testing.assert_allclose(np.asarray(o1), np.asarray(x[..., 6:]))

    # 2) Docstring example: (100, 10) -> (3, 7) on dim=-1 (forced Pallas path).
    data = jax.random.normal(k2, (100, 10), dtype=jnp.float32)
    s1, s2 = jax.block_until_ready(
        split_pallas(data, (3, 7), dim=-1, force_pallas=True))
    assert s1.shape == (100, 3) and s2.shape == (100, 7)
    np.testing.assert_allclose(np.asarray(s1), np.asarray(data[:, :3]))
    np.testing.assert_allclose(np.asarray(s2), np.asarray(data[:, 3:]))

    # 2b) Same input through the auto-dispatch (tiny -> plain slices) path.
    t1, t2 = jax.block_until_ready(split_pallas(data, (3, 7), dim=-1))
    np.testing.assert_allclose(np.asarray(t1), np.asarray(data[:, :3]))
    np.testing.assert_allclose(np.asarray(t2), np.asarray(data[:, 3:]))

    # 3) Split along a non-last axis.
    y = jax.random.normal(k3, (2, 12, 16, 16), dtype=jnp.float32)
    a, b = jax.block_until_ready(
        split_pallas(y, (4, 8), dim=1, force_pallas=True))
    assert a.shape == (2, 4, 16, 16) and b.shape == (2, 8, 16, 16)
    np.testing.assert_allclose(np.asarray(a), np.asarray(y[:, :4]))
    np.testing.assert_allclose(np.asarray(b), np.asarray(y[:, 4:]))

    # 4) Large enough to take the tiled, pipelined Pallas path automatically
    #    (multiple row tiles with a ragged last tile; lane-dense outputs).
    z = jax.random.normal(k4, (1024, 2048), dtype=jnp.float32)
    z0, z1, z2 = jax.block_until_ready(split_pallas(z, (1024, 512, 512), dim=-1))
    np.testing.assert_allclose(np.asarray(z0), np.asarray(z[:, :1024]))
    np.testing.assert_allclose(np.asarray(z1), np.asarray(z[:, 1024:1536]))
    np.testing.assert_allclose(np.asarray(z2), np.asarray(z[:, 1536:]))

    print("KERNEL_OK")
</pallas_src>

<mosaic_0001>
module attributes {stable_mosaic.version = 11 : i64} {
  func.func @_split_kernel(%arg0: i32, %arg1: memref<128x16xf32, #tpu.memory_space<vmem>>, %arg2: memref<128x6xf32, #tpu.memory_space<vmem>>, %arg3: memref<128x10xf32, #tpu.memory_space<vmem>>) attributes {dimension_semantics = [#tpu.dimension_semantics<parallel>], iteration_bounds = array<i64: 1>, scalar_prefetch = 0 : i64, scratch_operands = 0 : i64, tpu.core_type = #tpu.core_type<tc>, window_params = [{transform_indices = @transform_0, window_bounds = array<i64: 128, 16>}, {transform_indices = @transform_1, window_bounds = array<i64: 128, 6>}, {transform_indices = @transform_2, window_bounds = array<i64: 128, 10>}]} {
    %c0 = arith.constant 0 : index
    %c0_0 = arith.constant 0 : index
    %0 = vector.load %arg1[%c0, %c0_0] : memref<128x16xf32, #tpu.memory_space<vmem>>, vector<128x6xf32>
    %c0_1 = arith.constant 0 : index
    %c0_2 = arith.constant 0 : index
    %1 = vector.load %arg2[%c0_1, %c0_2] : memref<128x6xf32, #tpu.memory_space<vmem>>, vector<128x6xf32>
    tpu.vector_store %arg2[%c0_1, %c0_2], %0 {strides = array<i32>} : memref<128x6xf32, #tpu.memory_space<vmem>>, vector<128x6xf32>,
    %c0_3 = arith.constant 0 : index
    %c6 = arith.constant 6 : index
    %2 = vector.load %arg1[%c0_3, %c6] : memref<128x16xf32, #tpu.memory_space<vmem>>, vector<128x10xf32>
    %c0_4 = arith.constant 0 : index
    %c0_5 = arith.constant 0 : index
    %3 = vector.load %arg3[%c0_4, %c0_5] : memref<128x10xf32, #tpu.memory_space<vmem>>, vector<128x10xf32>
    tpu.vector_store %arg3[%c0_4, %c0_5], %2 {strides = array<i32>} : memref<128x10xf32, #tpu.memory_space<vmem>>, vector<128x10xf32>,
    return
  }
  func.func @transform_0(%arg0: i32) -> (i32, i32) {
    %c0_i32 = arith.constant 0 : i32
    %c0_i32_0 = arith.constant 0 : i32
    return %arg0, %c0_i32 : i32, i32
  }
  func.func @transform_1(%arg0: i32) -> (i32, i32) {
    %c0_i32 = arith.constant 0 : i32
    %c0_i32_0 = arith.constant 0 : i32
    return %arg0, %c0_i32 : i32, i32
  }
  func.func @transform_2(%arg0: i32) -> (i32, i32) {
    %c0_i32 = arith.constant 0 : i32
    %c0_i32_0 = arith.constant 0 : i32
    return %arg0, %c0_i32 : i32, i32
  }
}

</mosaic_0001>

<bundles_post_ra>
// kernel: tpu_custom_call.1
= control target key start
LH: loop header
LB: loop body
LE: loop exit
PB: predicated region body
PF: predicated region fallthrough
CT: control target
= control target key end

     0   :  { %vm26_vm0 = vcmask 48128   ;;  %s149_s15 = smov 122   ;;  %vm123_vm1 = vcmask 80896   ;;  %s357_s0 = inlined_call_operand.vmem [shape: f32[128,16], index: 0, kind: input, shape index: {}]   ;;  %s358_s1 = inlined_call_operand.vmem [shape: f32[128,6], index: 1, kind: output, shape index: {0}]   ;;  %s359_s2 = inlined_call_operand.vmem [shape: f32[128,10], index: 2, kind: output, shape index: {1}]  }
   0x1   :  { %v45_v0 = vld [vmem:[%s357_s0 + $0x10] sm:$0xff]  ;;  %v10_v1 = vld [vmem:[%s357_s0] sm:$0xff]  ;;  %v11_v2 = vld [vmem:[%s357_s0 + $0x8] sm:$0xff] }
   0x2   :  { %79 = vrot.lane.b32.xlu1 %v45_v0, %s149_s15  ;;  %v13_v3 = vld [vmem:[%s357_s0 + $0x18] sm:$0xff]  ;;  %v14_v4 = vld [vmem:[%s357_s0 + $0x20] sm:$0xff]  ;;  %v15_v5 = vld [vmem:[%s357_s0 + $0x28] sm:$0xff] }
   0x3   :  { %27 = vst.msk [vmem:[%s358_s1] sm:$0xff] %vm26_vm0, %v10_v1  ;;  %28 = vst.msk [vmem:[%s358_s1 + $0x8] sm:$0xff] %vm26_vm0, %v11_v2  ;;  %v16_v6 = vld [vmem:[%s357_s0 + $0x30] sm:$0xff]  ;;  %v17_v7 = vld [vmem:[%s357_s0 + $0x38] sm:$0xff] }
   0x4   :  { %29 = vst.msk [vmem:[%s358_s1 + $0x10] sm:$0xff] %vm26_vm0, %v45_v0  ;;  %v18_v8 = vld [vmem:[%s357_s0 + $0x40] sm:$0xff]  ;;  %30 = vst.msk [vmem:[%s358_s1 + $0x18] sm:$0xff] %vm26_vm0, %v13_v3  ;;  %75 = vrot.lane.b32.xlu0 %v10_v1, %s149_s15 }
   0x5   :  { %31 = vst.msk [vmem:[%s358_s1 + $0x20] sm:$0xff] %vm26_vm0, %v14_v4  ;;  %32 = vst.msk [vmem:[%s358_s1 + $0x28] sm:$0xff] %vm26_vm0, %v15_v5  ;;  %v19_v9 = vld [vmem:[%s357_s0 + $0x48] sm:$0xff]  ;;  %v20_v10 = vld [vmem:[%s357_s0 + $0x50] sm:$0xff] }
   0x6   :  { %v21_v11 = vld [vmem:[%s357_s0 + $0x58] sm:$0xff]  ;;  %33 = vst.msk [vmem:[%s358_s1 + $0x30] sm:$0xff] %vm26_vm0, %v16_v6  ;;  %34 = vst.msk [vmem:[%s358_s1 + $0x38] sm:$0xff] %vm26_vm0, %v17_v7  ;;  %v22_v12 = vld [vmem:[%s357_s0 + $0x60] sm:$0xff] }
   0x7   :  { %35 = vst.msk [vmem:[%s358_s1 + $0x40] sm:$0xff] %vm26_vm0, %v18_v8  ;;  %v23_v13 = vld [vmem:[%s357_s0 + $0x68] sm:$0xff]  ;;  %v24_v14 = vld [vmem:[%s357_s0 + $0x70] sm:$0xff]  ;;  %36 = vst.msk [vmem:[%s358_s1 + $0x48] sm:$0xff] %vm26_vm0, %v19_v9 }
   0x8   :  { %37 = vst.msk [vmem:[%s358_s1 + $0x50] sm:$0xff] %vm26_vm0, %v20_v10  ;;  %38 = vst.msk [vmem:[%s358_s1 + $0x58] sm:$0xff] %vm26_vm0, %v21_v11  ;;  %v25_v15 = vld [vmem:[%s357_s0 + $0x78] sm:$0xff]  ;;  %81 = vrot.lane.b32.xlu1 %v13_v3, %s149_s15 }
   0x9   :  { %39 = vst.msk [vmem:[%s358_s1 + $0x60] sm:$0xff] %vm26_vm0, %v22_v12  ;;  %40 = vst.msk [vmem:[%s358_s1 + $0x68] sm:$0xff] %vm26_vm0, %v23_v13  ;;  %77 = vrot.lane.b32.xlu0 %v11_v2, %s149_s15 }
   0xa   :  { %41 = vst.msk [vmem:[%s358_s1 + $0x70] sm:$0xff] %vm26_vm0, %v24_v14  ;;  %42 = vst.msk [vmem:[%s358_s1 + $0x78] sm:$0xff] %vm26_vm0, %v25_v15 }
   0xc   :  { %85 = vrot.lane.b32.xlu1 %v15_v5, %s149_s15 }
   0xd   :  { %83 = vrot.lane.b32.xlu0 %v14_v4, %s149_s15 }
  0x10   :  { %89 = vrot.lane.b32.xlu1 %v17_v7, %s149_s15 }
  0x11   :  { %87 = vrot.lane.b32.xlu0 %v16_v6, %s149_s15 }
  0x14   :  { %93 = vrot.lane.b32.xlu1 %v19_v9, %s149_s15 }
  0x15   :  { %91 = vrot.lane.b32.xlu0 %v18_v8, %s149_s15 }
  0x18   :  { %97 = vrot.lane.b32.xlu1 %v21_v11, %s149_s15 }
  0x19   :  { %95 = vrot.lane.b32.xlu0 %v20_v10, %s149_s15 }
  0x1c   :  { %101 = vrot.lane.b32.xlu1 %v23_v13, %s149_s15 }
  0x1d   :  { %99 = vrot.lane.b32.xlu0 %v22_v12, %s149_s15 }
  0x20   :  { %105 = vrot.lane.b32.xlu1 %v25_v15, %s149_s15 }
  0x21   :  { %103 = vrot.lane.b32.xlu0 %v24_v14, %s149_s15 }
  0x74   :  { %v80_v16 = vpop.permute.xlu1 %79 }
  0x75   :  { %126 = vst.msk [vmem:[%s359_s2 + $0x10] sm:$0xff] %vm123_vm1, %v80_v16 }
  0x76   :  { %v76_v17 = vpop.permute.xlu0 %75 }
  0x77   :  { %124 = vst.msk [vmem:[%s359_s2] sm:$0xff] %vm123_vm1, %v76_v17 }
  0x7a   :  { %v82_v18 = vpop.permute.xlu1 %81 }
  0x7b   :  { %127 = vst.msk [vmem:[%s359_s2 + $0x18] sm:$0xff] %vm123_vm1, %v82_v18  ;;  %v78_v19 = vpop.permute.xlu0 %77 }
  0x7c   :  { %125 = vst.msk [vmem:[%s359_s2 + $0x8] sm:$0xff] %vm123_vm1, %v78_v19 }
  0x7e   :  { %v86_v20 = vpop.permute.xlu1 %85 }
  0x7f   :  { %129 = vst.msk [vmem:[%s359_s2 + $0x28] sm:$0xff] %vm123_vm1, %v86_v20  ;;  %v84_v21 = vpop.permute.xlu0 %83 }
  0x80   :  { %128 = vst.msk [vmem:[%s359_s2 + $0x20] sm:$0xff] %vm123_vm1, %v84_v21 }
  0x82   :  { %v90_v22 = vpop.permute.xlu1 %89 }
  0x83   :  { %131 = vst.msk [vmem:[%s359_s2 + $0x38] sm:$0xff] %vm123_vm1, %v90_v22  ;;  %v88_v23 = vpop.permute.xlu0 %87 }
  0x84   :  { %130 = vst.msk [vmem:[%s359_s2 + $0x30] sm:$0xff] %vm123_vm1, %v88_v23 }
  0x86   :  { %v94_v24 = vpop.permute.xlu1 %93 }
  0x87   :  { %133 = vst.msk [vmem:[%s359_s2 + $0x48] sm:$0xff] %vm123_vm1, %v94_v24  ;;  %v92_v25 = vpop.permute.xlu0 %91 }
  0x88   :  { %132 = vst.msk [vmem:[%s359_s2 + $0x40] sm:$0xff] %vm123_vm1, %v92_v25 }
  0x8a   :  { %v98_v26 = vpop.permute.xlu1 %97 }
  0x8b   :  { %135 = vst.msk [vmem:[%s359_s2 + $0x58] sm:$0xff] %vm123_vm1, %v98_v26  ;;  %v96_v27 = vpop.permute.xlu0 %95 }
  0x8c   :  { %134 = vst.msk [vmem:[%s359_s2 + $0x50] sm:$0xff] %vm123_vm1, %v96_v27 }
  0x8e   :  { %v102_v28 = vpop.permute.xlu1 %101 }
  0x8f   :  { %137 = vst.msk [vmem:[%s359_s2 + $0x68] sm:$0xff] %vm123_vm1, %v102_v28  ;;  %v100_v29 = vpop.permute.xlu0 %99 }
  0x90   :  { %136 = vst.msk [vmem:[%s359_s2 + $0x60] sm:$0xff] %vm123_vm1, %v100_v29 }
  0x92   :  { %v106_v30 = vpop.permute.xlu1 %105 }
  0x93   :  { %139 = vst.msk [vmem:[%s359_s2 + $0x78] sm:$0xff] %vm123_vm1, %v106_v30  ;;  %v104_v31 = vpop.permute.xlu0 %103 }
  0x94   :  { %138 = vst.msk [vmem:[%s359_s2 + $0x70] sm:$0xff] %vm123_vm1, %v104_v31 }

</bundles_post_ra>
